<compile_context>
chip_gen: v6e
topology: v6e:2x2x1
jax: 0.10.0
libtpu: 0.0.40
codegen_flags: <defaults>
</compile_context>

<pallas_src>
import numpy as np
import jax
import jax.numpy as jnp
from jax.experimental import pallas as pl
from jax.experimental.pallas import tpu as pltpu


# ----------------------------------------------------------------------------
# Channel schedule (mirrors Wavenet.__init__ exactly)
# ----------------------------------------------------------------------------
def wavenet_channel_schedule(conv_size, nb_of_measurements, nb_of_outputs):
    nb_layers = int(np.log2(conv_size))
    layer_change = int(
        np.floor((nb_of_measurements - nb_of_outputs) / int(np.log2(conv_size)))
    )
    in_c = nb_of_measurements
    out_c = nb_of_measurements - layer_change
    chans = []
    for i in range(nb_layers):
        chans.append((in_c, out_c))
        if (out_c >= nb_of_outputs - layer_change) & (nb_of_measurements >= nb_of_outputs) | \
           (out_c <= nb_of_outputs + layer_change) & (nb_of_measurements < nb_of_outputs):
            if i == nb_layers - 2:
                in_c = out_c
                out_c = nb_of_outputs
            else:
                in_c = in_c - layer_change
                out_c = out_c - layer_change
        else:
            in_c = nb_of_outputs
            out_c = nb_of_outputs
    return nb_layers, chans


# ----------------------------------------------------------------------------
# Bit-reversal permutation of the time axis:
# after permuting by this, every stride-2 "pair adjacent timesteps" layer
# becomes "pair first half with second half" (two contiguous row slices).
# ----------------------------------------------------------------------------
def _pairing_permutation(T):
    p = np.array([0], dtype=np.int32)
    while p.size < T:
        p = np.concatenate([2 * p, 2 * p + 1])
    return p


# ----------------------------------------------------------------------------
# One-time parameter packing (hoisted out of the forward pass)
# PyTorch Conv1d weight (Cout, Cin, 2) -> W0, W1 of shape (Cin, Cout);
# bias (Cout,) -> (1, Cout).
# ----------------------------------------------------------------------------
def pack_params(weights, biases):
    packed = []
    for w, b in zip(weights, biases):
        cout, cin, _ = w.shape
        w0 = jnp.transpose(w[:, :, 0], (1, 0)).astype(jnp.float32)  # even tap
        w1 = jnp.transpose(w[:, :, 1], (1, 0)).astype(jnp.float32)  # odd tap
        packed += [w0, w1, b.reshape(1, cout).astype(jnp.float32)]
    return packed


# ----------------------------------------------------------------------------
# Fused Pallas kernel: all layers in one pass, activations VMEM-resident.
# Activation layout inside a tile: 2-D (t * TILE_B, C), row = time*TILE_B + b.
# Each layer: h_first-half @ W0 + h_second-half @ W1 + bias  -> halves t.
# ----------------------------------------------------------------------------
def _make_fused_kernel(nb_layers, T, tile_b):
    def kernel(*refs):
        x_ref = refs[0]
        o_ref = refs[-1]
        wb = refs[1:-1]                 # (W0_0, W1_0, b_0, W0_1, W1_1, b_1, ...)

        h = x_ref[0]                    # (T * tile_b, C0) f32
        t = T
        for i in range(nb_layers):      # static unroll: layers stay in VMEM
            w0 = wb[3 * i][...]         # (cin, cout)
            w1 = wb[3 * i + 1][...]     # (cin, cout)
            b = wb[3 * i + 2][...]      # (1, cout)
            half = (t // 2) * tile_b
            h = (jnp.dot(h[:half, :], w0, preferred_element_type=jnp.float32)
                 + jnp.dot(h[half:, :], w1, preferred_element_type=jnp.float32)
                 + b)
            t //= 2
        # t == 1  ->  h is (tile_b, c_last)
        o_ref[0] = h.astype(o_ref.dtype)

    return kernel


def _choose_tile_b(B, T, C0):
    # Size the per-tile input block (double-buffered by the pipeline) to a few
    # MiB so it fits comfortably under v7x's 64 MiB VMEM / 32 MiB scoped limit.
    budget_rows = max(8, (4 * 1024 * 1024) // (T * max(C0, 1) * 4))
    tile_b = min(512, budget_rows)
    tile_b = max(8, (tile_b // 8) * 8)
    if B <= tile_b:
        return B
    return tile_b


# ----------------------------------------------------------------------------
# Full forward pass
# ----------------------------------------------------------------------------
def wavenet_forward(x_nct, packed_params, chans, *, tile_b=None):
    """x_nct: (B, C0, T) float32, PyTorch NCT layout."""
    B, C0, T = x_nct.shape
    nb_layers = len(chans)
    assert T == 2 ** nb_layers, "conv_size must be a power of two"
    c_last = chans[-1][1]

    if tile_b is None:
        tile_b = _choose_tile_b(B, T, C0)
    num_tiles = -(-B // tile_b)          # ceil division
    b_pad = num_tiles * tile_b

    # --- plain-JAX layout glue (cheap, once per call) -------------------------
    perm = _pairing_permutation(T)
    xp = x_nct[:, :, perm]                              # permute time axis
    xp = jnp.transpose(xp, (2, 0, 1))                   # (T, B, C0), time-major
    if b_pad != B:
        xp = jnp.pad(xp, ((0, 0), (0, b_pad - B), (0, 0)))
    xp = xp.reshape(T, num_tiles, tile_b, C0)
    xp = jnp.transpose(xp, (1, 0, 2, 3)).reshape(num_tiles, T * tile_b, C0)

    # --- BlockSpecs ------------------------------------------------------------
    in_specs = [pl.BlockSpec((1, T * tile_b, C0), lambda i: (i, 0, 0))]
    for (cin, cout) in chans:
        # weights / bias: full-array blocks, same block index each step -> resident
        in_specs += [
            pl.BlockSpec((cin, cout), lambda i: (0, 0)),
            pl.BlockSpec((cin, cout), lambda i: (0, 0)),
            pl.BlockSpec((1, cout), lambda i: (0, 0)),
        ]
    out_spec = pl.BlockSpec((1, tile_b, c_last), lambda i: (i, 0, 0))

    # --- cost estimate ----------------------------------------------------------
    flops = 0
    t = T
    for (cin, cout) in chans:
        flops += 2 * 2 * (t // 2) * b_pad * cin * cout   # two matmuls per layer
        t //= 2
    bytes_accessed = (xp.size * 4 + b_pad * c_last * 4
                      + sum(2 * cin * cout * 4 + cout * 4 for (cin, cout) in chans))

    kernel = _make_fused_kernel(nb_layers, T, tile_b)
    out = pl.pallas_call(
        kernel,
        out_shape=jax.ShapeDtypeStruct((num_tiles, tile_b, c_last), jnp.float32),
        grid=(num_tiles,),
        in_specs=in_specs,
        out_specs=out_spec,
        compiler_params=pltpu.CompilerParams(
            dimension_semantics=("parallel",),          # shards tiles across TCs on v7x
            vmem_limit_bytes=32 * 1024 * 1024,
        ),
        cost_estimate=pl.CostEstimate(
            flops=flops, transcendentals=0, bytes_accessed=bytes_accessed),
    )(xp, *packed_params)

    out = out.reshape(b_pad, c_last)[:B]
    # PyTorch output before .squeeze() is (B, C_out, 1); .squeeze() == squeeze here.
    return jnp.squeeze(out)


# ----------------------------------------------------------------------------
# Pure-JAX reference (matches torch.nn.Conv1d semantics) for validation
# ----------------------------------------------------------------------------
def wavenet_forward_ref(x_nct, weights, biases):
    h = x_nct
    for w, b in zip(weights, biases):
        h = jax.lax.conv_general_dilated(
            h, w, window_strides=(2,), padding="VALID",
            dimension_numbers=("NCH", "OIH", "NCH"),
        ) + b[None, :, None]
    return jnp.squeeze(h)


# ----------------------------------------------------------------------------
# Deterministic parameter init (PyTorch Conv1d default: U(-1/sqrt(fan_in), +))
# ----------------------------------------------------------------------------
def init_params(key, chans):
    weights, biases = [], []
    for (cin, cout) in chans:
        key, kw, kb = jax.random.split(key, 3)
        bound = 1.0 / np.sqrt(cin * 2)
        weights.append(jax.random.uniform(kw, (cout, cin, 2), jnp.float32, -bound, bound))
        biases.append(jax.random.uniform(kb, (cout,), jnp.float32, -bound, bound))
    return weights, biases


if __name__ == "__main__":
    def run_case(conv_size, nb_meas, nb_out, batch, seed, tile_b=None):
        nb_layers, chans = wavenet_channel_schedule(conv_size, nb_meas, nb_out)

        key = jax.random.PRNGKey(seed)
        key, kx = jax.random.split(key)
        x = jax.random.normal(kx, (batch, nb_meas, conv_size), jnp.float32)
        weights, biases = init_params(key, chans)
        packed = pack_params(weights, biases)

        fwd = jax.jit(lambda xx, *pp: wavenet_forward(xx, list(pp), chans, tile_b=tile_b))
        y = jax.block_until_ready(fwd(x, *packed))
        y_ref = jax.block_until_ready(wavenet_forward_ref(x, weights, biases))

        assert y.shape == y_ref.shape, (y.shape, y_ref.shape)
        np.testing.assert_allclose(np.asarray(y), np.asarray(y_ref),
                                   rtol=1e-5, atol=1e-5)
        return y

    # Case 1: small config (conv_size=8 -> 3 layers, 4 measurements, 2 outputs).
    run_case(conv_size=8, nb_meas=4, nb_out=2, batch=2, seed=0)
    # Case 2: exercises the batch-tiled grid (3 tiles of 8 rows, with padding).
    run_case(conv_size=16, nb_meas=6, nb_out=3, batch=20, seed=1, tile_b=8)

    print("KERNEL_OK")
</pallas_src>

<mosaic_0001>
module attributes {stable_mosaic.version = 11 : i64} {
  func.func @kernel(%arg0: i32, %arg1: memref<1x16x4xf32, #tpu.memory_space<vmem>>, %arg2: memref<4x4xf32, #tpu.memory_space<vmem>>, %arg3: memref<4x4xf32, #tpu.memory_space<vmem>>, %arg4: memref<1x4xf32, #tpu.memory_space<vmem>>, %arg5: memref<4x4xf32, #tpu.memory_space<vmem>>, %arg6: memref<4x4xf32, #tpu.memory_space<vmem>>, %arg7: memref<1x4xf32, #tpu.memory_space<vmem>>, %arg8: memref<4x2xf32, #tpu.memory_space<vmem>>, %arg9: memref<4x2xf32, #tpu.memory_space<vmem>>, %arg10: memref<1x2xf32, #tpu.memory_space<vmem>>, %arg11: memref<1x2x2xf32, #tpu.memory_space<vmem>>) attributes {dimension_semantics = [#tpu.dimension_semantics<parallel>], iteration_bounds = array<i64: 1>, scalar_prefetch = 0 : i64, scratch_operands = 0 : i64, tpu.core_type = #tpu.core_type<tc>, window_params = [{transform_indices = @transform_0, window_bounds = array<i64: 1, 16, 4>}, {pipeline_mode = #tpu.pipeline_mode<synchronous>, transform_indices = @transform_1, window_bounds = array<i64: 4, 4>}, {pipeline_mode = #tpu.pipeline_mode<synchronous>, transform_indices = @transform_2, window_bounds = array<i64: 4, 4>}, {pipeline_mode = #tpu.pipeline_mode<synchronous>, transform_indices = @transform_3, window_bounds = array<i64: 1, 4>}, {pipeline_mode = #tpu.pipeline_mode<synchronous>, transform_indices = @transform_4, window_bounds = array<i64: 4, 4>}, {pipeline_mode = #tpu.pipeline_mode<synchronous>, transform_indices = @transform_5, window_bounds = array<i64: 4, 4>}, {pipeline_mode = #tpu.pipeline_mode<synchronous>, transform_indices = @transform_6, window_bounds = array<i64: 1, 4>}, {pipeline_mode = #tpu.pipeline_mode<synchronous>, transform_indices = @transform_7, window_bounds = array<i64: 4, 2>}, {pipeline_mode = #tpu.pipeline_mode<synchronous>, transform_indices = @transform_8, window_bounds = array<i64: 4, 2>}, {pipeline_mode = #tpu.pipeline_mode<synchronous>, transform_indices = @transform_9, window_bounds = array<i64: 1, 2>}, {transform_indices = @transform_10, window_bounds = array<i64: 1, 2, 2>}]} {
    %c0 = arith.constant 0 : index
    %c0_0 = arith.constant 0 : index
    %c0_1 = arith.constant 0 : index
    %0 = vector.load %arg1[%c0, %c0_0, %c0_1] : memref<1x16x4xf32, #tpu.memory_space<vmem>>, vector<1x16x4xf32>
    %1 = vector.shape_cast %0 : vector<1x16x4xf32> to vector<16x4xf32>
    %c0_2 = arith.constant 0 : index
    %c0_3 = arith.constant 0 : index
    %2 = vector.load %arg2[%c0_2, %c0_3] : memref<4x4xf32, #tpu.memory_space<vmem>>, vector<4x4xf32>
    %c0_4 = arith.constant 0 : index
    %c0_5 = arith.constant 0 : index
    %3 = vector.load %arg3[%c0_4, %c0_5] : memref<4x4xf32, #tpu.memory_space<vmem>>, vector<4x4xf32>
    %c0_6 = arith.constant 0 : index
    %c0_7 = arith.constant 0 : index
    %4 = vector.load %arg4[%c0_6, %c0_7] : memref<1x4xf32, #tpu.memory_space<vmem>>, vector<1x4xf32>
    %5 = vector.extract_strided_slice %1 {offsets = [0, 0], sizes = [8, 4], strides = [1, 1]} : vector<16x4xf32> to vector<8x4xf32>
    %cst = arith.constant dense<0.000000e+00> : vector<8x4xf32>
    %6 = tpu.matmul %5, %2, %cst {dimension_numbers = #tpu.dot_dimension_numbers<[1], [0], [0], [1], [0, 0, 1, 1], [], []>} : vector<8x4xf32>, vector<4x4xf32>, vector<8x4xf32> -> vector<8x4xf32>
    %7 = vector.extract_strided_slice %1 {offsets = [8, 0], sizes = [8, 4], strides = [1, 1]} : vector<16x4xf32> to vector<8x4xf32>
    %cst_8 = arith.constant dense<0.000000e+00> : vector<8x4xf32>
    %8 = tpu.matmul %7, %3, %cst_8 {dimension_numbers = #tpu.dot_dimension_numbers<[1], [0], [0], [1], [0, 0, 1, 1], [], []>} : vector<8x4xf32>, vector<4x4xf32>, vector<8x4xf32> -> vector<8x4xf32>
    %9 = arith.addf %6, %8 : vector<8x4xf32>
    %10 = vector.broadcast %4 : vector<1x4xf32> to vector<8x4xf32>
    %11 = arith.addf %9, %10 : vector<8x4xf32>
    %c0_9 = arith.constant 0 : index
    %c0_10 = arith.constant 0 : index
    %12 = vector.load %arg5[%c0_9, %c0_10] : memref<4x4xf32, #tpu.memory_space<vmem>>, vector<4x4xf32>
    %c0_11 = arith.constant 0 : index
    %c0_12 = arith.constant 0 : index
    %13 = vector.load %arg6[%c0_11, %c0_12] : memref<4x4xf32, #tpu.memory_space<vmem>>, vector<4x4xf32>
    %c0_13 = arith.constant 0 : index
    %c0_14 = arith.constant 0 : index
    %14 = vector.load %arg7[%c0_13, %c0_14] : memref<1x4xf32, #tpu.memory_space<vmem>>, vector<1x4xf32>
    %15 = vector.extract_strided_slice %11 {offsets = [0, 0], sizes = [4, 4], strides = [1, 1]} : vector<8x4xf32> to vector<4x4xf32>
    %cst_15 = arith.constant dense<0.000000e+00> : vector<4x4xf32>
    %16 = tpu.matmul %15, %12, %cst_15 {dimension_numbers = #tpu.dot_dimension_numbers<[1], [0], [0], [1], [0, 0, 1, 1], [], []>} : vector<4x4xf32>, vector<4x4xf32>, vector<4x4xf32> -> vector<4x4xf32>
    %17 = vector.extract_strided_slice %11 {offsets = [4, 0], sizes = [4, 4], strides = [1, 1]} : vector<8x4xf32> to vector<4x4xf32>
    %cst_16 = arith.constant dense<0.000000e+00> : vector<4x4xf32>
    %18 = tpu.matmul %17, %13, %cst_16 {dimension_numbers = #tpu.dot_dimension_numbers<[1], [0], [0], [1], [0, 0, 1, 1], [], []>} : vector<4x4xf32>, vector<4x4xf32>, vector<4x4xf32> -> vector<4x4xf32>
    %19 = arith.addf %16, %18 : vector<4x4xf32>
    %20 = vector.broadcast %14 : vector<1x4xf32> to vector<4x4xf32>
    %21 = arith.addf %19, %20 : vector<4x4xf32>
    %c0_17 = arith.constant 0 : index
    %c0_18 = arith.constant 0 : index
    %22 = vector.load %arg8[%c0_17, %c0_18] : memref<4x2xf32, #tpu.memory_space<vmem>>, vector<4x2xf32>
    %c0_19 = arith.constant 0 : index
    %c0_20 = arith.constant 0 : index
    %23 = vector.load %arg9[%c0_19, %c0_20] : memref<4x2xf32, #tpu.memory_space<vmem>>, vector<4x2xf32>
    %c0_21 = arith.constant 0 : index
    %c0_22 = arith.constant 0 : index
    %24 = vector.load %arg10[%c0_21, %c0_22] : memref<1x2xf32, #tpu.memory_space<vmem>>, vector<1x2xf32>
    %25 = vector.extract_strided_slice %21 {offsets = [0, 0], sizes = [2, 4], strides = [1, 1]} : vector<4x4xf32> to vector<2x4xf32>
    %cst_23 = arith.constant dense<0.000000e+00> : vector<2x2xf32>
    %26 = tpu.matmul %25, %22, %cst_23 {dimension_numbers = #tpu.dot_dimension_numbers<[1], [0], [0], [1], [0, 0, 1, 1], [], []>} : vector<2x4xf32>, vector<4x2xf32>, vector<2x2xf32> -> vector<2x2xf32>
    %27 = vector.extract_strided_slice %21 {offsets = [2, 0], sizes = [2, 4], strides = [1, 1]} : vector<4x4xf32> to vector<2x4xf32>
    %cst_24 = arith.constant dense<0.000000e+00> : vector<2x2xf32>
    %28 = tpu.matmul %27, %23, %cst_24 {dimension_numbers = #tpu.dot_dimension_numbers<[1], [0], [0], [1], [0, 0, 1, 1], [], []>} : vector<2x4xf32>, vector<4x2xf32>, vector<2x2xf32> -> vector<2x2xf32>
    %29 = arith.addf %26, %28 : vector<2x2xf32>
    %30 = vector.broadcast %24 : vector<1x2xf32> to vector<2x2xf32>
    %31 = arith.addf %29, %30 : vector<2x2xf32>
    %c0_25 = arith.constant 0 : index
    %c0_26 = arith.constant 0 : index
    %c0_27 = arith.constant 0 : index
    %32 = vector.load %arg11[%c0_25, %c0_26, %c0_27] : memref<1x2x2xf32, #tpu.memory_space<vmem>>, vector<1x2x2xf32>
    %33 = vector.shape_cast %32 : vector<1x2x2xf32> to vector<2x2xf32>
    %34 = vector.shape_cast %31 : vector<2x2xf32> to vector<1x2x2xf32>
    tpu.vector_store %arg11[%c0_25, %c0_26, %c0_27], %34 {strides = array<i32>} : memref<1x2x2xf32, #tpu.memory_space<vmem>>, vector<1x2x2xf32>,
    return
  }
  func.func @transform_0(%arg0: i32) -> (i32, i32, i32) {
    %c0_i32 = arith.constant 0 : i32
    %c0_i32_0 = arith.constant 0 : i32
    %c0_i32_1 = arith.constant 0 : i32
    return %arg0, %c0_i32, %c0_i32_0 : i32, i32, i32
  }
  func.func @transform_1(%arg0: i32) -> (i32, i32) {
    %c0_i32 = arith.constant 0 : i32
    %c0_i32_0 = arith.constant 0 : i32
    %c0_i32_1 = arith.constant 0 : i32
    return %c0_i32, %c0_i32_0 : i32, i32
  }
  func.func @transform_2(%arg0: i32) -> (i32, i32) {
    %c0_i32 = arith.constant 0 : i32
    %c0_i32_0 = arith.constant 0 : i32
    %c0_i32_1 = arith.constant 0 : i32
    return %c0_i32, %c0_i32_0 : i32, i32
  }
  func.func @transform_3(%arg0: i32) -> (i32, i32) {
    %c0_i32 = arith.constant 0 : i32
    %c0_i32_0 = arith.constant 0 : i32
    %c0_i32_1 = arith.constant 0 : i32
    return %c0_i32, %c0_i32_0 : i32, i32
  }
  func.func @transform_4(%arg0: i32) -> (i32, i32) {
    %c0_i32 = arith.constant 0 : i32
    %c0_i32_0 = arith.constant 0 : i32
    %c0_i32_1 = arith.constant 0 : i32
    return %c0_i32, %c0_i32_0 : i32, i32
  }
  func.func @transform_5(%arg0: i32) -> (i32, i32) {
    %c0_i32 = arith.constant 0 : i32
    %c0_i32_0 = arith.constant 0 : i32
    %c0_i32_1 = arith.constant 0 : i32
    return %c0_i32, %c0_i32_0 : i32, i32
  }
  func.func @transform_6(%arg0: i32) -> (i32, i32) {
    %c0_i32 = arith.constant 0 : i32
    %c0_i32_0 = arith.constant 0 : i32
    %c0_i32_1 = arith.constant 0 : i32
    return %c0_i32, %c0_i32_0 : i32, i32
  }
  func.func @transform_7(%arg0: i32) -> (i32, i32) {
    %c0_i32 = arith.constant 0 : i32
    %c0_i32_0 = arith.constant 0 : i32
    %c0_i32_1 = arith.constant 0 : i32
    return %c0_i32, %c0_i32_0 : i32, i32
  }
  func.func @transform_8(%arg0: i32) -> (i32, i32) {
    %c0_i32 = arith.constant 0 : i32
    %c0_i32_0 = arith.constant 0 : i32
    %c0_i32_1 = arith.constant 0 : i32
    return %c0_i32, %c0_i32_0 : i32, i32
  }
  func.func @transform_9(%arg0: i32) -> (i32, i32) {
    %c0_i32 = arith.constant 0 : i32
    %c0_i32_0 = arith.constant 0 : i32
    %c0_i32_1 = arith.constant 0 : i32
    return %c0_i32, %c0_i32_0 : i32, i32
  }
  func.func @transform_10(%arg0: i32) -> (i32, i32, i32) {
    %c0_i32 = arith.constant 0 : i32
    %c0_i32_0 = arith.constant 0 : i32
    %c0_i32_1 = arith.constant 0 : i32
    return %arg0, %c0_i32, %c0_i32_0 : i32, i32, i32
  }
}

</mosaic_0001>

<bundles_post_ra>
// kernel: _lambda_.1
= control target key start
LH: loop header
LB: loop body
LE: loop exit
PB: predicated region body
PF: predicated region fallthrough
CT: control target
= control target key end

     0   :  { %vm45_vm0 = vcmask 1043456   ;;  %v624_v2 = vmov 0.0   ;;  %vm41_vm1 = vcmask 31744   ;;  %s736_s0 = inlined_call_operand.vmem [shape: f32[1,16,4], index: 0, kind: input, shape index: {}]   ;;  %s737_s1 = inlined_call_operand.vmem [shape: f32[4,4], index: 1, kind: input, shape index: {}]   ;;  %s738_s2 = inlined_call_operand.vmem [shape: f32[4,4], index: 2, kind: input, shape index: {}]   ;;  %s739_s3 = inlined_call_operand.vmem [shape: f32[1,4], index: 3, kind: input, shape index: {}]   ;;  %s740_s4 = inlined_call_operand.vmem [shape: f32[4,4], index: 4, kind: input, shape index: {}]   ;;  %s741_s5 = inlined_call_operand.vmem [shape: f32[4,4], index: 5, kind: input, shape index: {}]   ;;  %s742_s6 = inlined_call_operand.vmem [shape: f32[1,4], index: 6, kind: input, shape index: {}]   ;;  %s743_s7 = inlined_call_operand.vmem [shape: f32[4,2], index: 7, kind: input, shape index: {}]   ;;  %s744_s8 = inlined_call_operand.vmem [shape: f32[4,2], index: 8, kind: input, shape index: {}]   ;;  %s745_s9 = inlined_call_operand.vmem [shape: f32[1,2], index: 9, kind: input, shape index: {}]   ;;  %s746_s10 = inlined_call_operand.hbm [shape: f32[1,2,2], index: 10, kind: output, shape index: {}]  }
   0x1   :  { %v39_v0 = vld [vmem:[%s738_s2] sm:$0xf]  ;;  %v37_v1 = vld [vmem:[%s736_s0 + $0x8] sm:$0xff]  ;;  %569 = vmatprep.subr.mxu0 %v624_v2  ;;  %574 = vmatprep.subr.mxu1 %v624_v2 }
   0x2   :  { %v38_v3 = vld [vmem:[%s737_s1] sm:$0xf] }
   0x3   :  { %v36_v4 = vld [vmem:[%s736_s0] sm:$0xff] }
   0x4   :  { %15 = vsyncpa [#allocation3], 0  ;;  %570 = vmatpush3.msk.msra.mxu0 %vm45_vm0, %v39_v0  ;;  %vm625_vm2 = vmmov 0   ;;  %575 = vmatpush3.msk.msra.mxu1 %vm45_vm0, %v38_v3  ;;  %v202_v5 = vld [vmem:[%s740_s4] sm:$0xf]  ;;  %s626_s27 = smov [#allocation2]  }
   0x5   :  { %571 = vmatprep.mubr.msk.f32.mxu0 %vm625_vm2, %v624_v2  ;;  %576 = vmatprep.mubr.msk.f32.mxu1 %vm625_vm2, %v624_v2  ;;  %v203_v6 = vld [vmem:[%s741_s5] sm:$0xf]  ;;  %s534_s28 = sshll.u32 %s626_s27, 4  ;;  %vm526_vm3 = vcmask 9216   ;;  %s535_s28 = int_to_ptr.vmem [resolvable:$true] %s534_s28 }
   0x6   :  { %572 = vmatmul.mubr.msk.f32.vlgmr.msra.gmra.mxu0 %vm41_vm1, %v37_v1  ;;  %577 = vmatmul.mubr.msk.f32.vlgmr.msra.gmra.mxu1 %vm41_vm1, %v36_v4  ;;  %v546_v8 = vld [vmem:[%s739_s3] ss:$0 sm:$0xff]  ;;  %p607_p1 = scmp.lt.s32.totalorder %s535_s28, %s535_s28 }
   0x7   :  { %579 = vmatprep.subr.mxu0 %v624_v2  ;;  %584 = vmatprep.subr.mxu1 %v624_v2  ;;  %v364_v15 = vld [vmem:[%s743_s7] sm:$0xf] }
   0x8   :  { %586 = vmatprep.mubr.msk.f32.mxu1 %vm625_vm2, %v624_v2  ;;  %581 = vmatprep.mubr.msk.f32.mxu0 %vm625_vm2, %v624_v2  ;;  %v365_v16 = vld [vmem:[%s744_s8] sm:$0xf] }
   0x9   :  { %585 = vmatpush3.msk.msra.mxu1 %vm45_vm0, %v202_v5  ;;  %580 = vmatpush3.msk.msra.mxu0 %vm45_vm0, %v203_v6  ;;  %v551_v18 = vld [vmem:[%s742_s6] ss:$0 sm:$0xff]  ;;  %s602_s6 = scalar_lea.vmem %s535_s28, 32 }
   0xa   :  { %594 = vmatprep.subr.mxu1 %v624_v2  ;;  %589 = vmatprep.subr.mxu0 %v624_v2  ;;  %v556_v26 = vld [vmem:[%s745_s9] ss:$0 sm:$0xff]  ;;  %p603_p0 = scmp.ne.s32.totalorder %s535_s28, %s602_s6  ;;  %p608_p2 = scmp.lt.s32.totalorder %s602_s6, %s602_s6 }
   0xc   :  { %p609_p3 = por %p608_p2, %p607_p1 }
   0xe   :  { %p610_p4 = pnand %p609_p3, %p603_p0 }
  0xc6   :  { %v115_v7 = vpop.f32.mrf.mxu0  ;;  %v191_v9 = vpop.f32.mrf.mxu1 }
  0xc7   :  { %v192_v10 = vadd.f32 %v191_v9, %v115_v7 }
  0xc8   :  { %v573_v11 = vpop.f32.mrf.mxu0  ;;  %v578_v12 = vpop.f32.mrf.mxu1 }
  0xc9   :  { %v201_v13 = vadd.f32 %v546_v8, %v192_v10 }
  0xcb   :  { %v206_v14 = vrot.slane %v201_v13, 4  ;;  %587 = vmatmul.mubr.msk.f32.vlgmr.msra.gmra.mxu1 %vm41_vm1, %v201_v13 }
  0xcc   :  { %596 = vmatprep.mubr.msk.f32.mxu1 %vm625_vm2, %v624_v2  ;;  %595 = vmatpush3.msk.msra.mxu1 %vm45_vm0, %v364_v15 }
  0xcd   :  { %582 = vmatmul.mubr.msk.f32.vlgmr.msra.gmra.mxu0 %vm41_vm1, %v206_v14 }
  0xce   :  { %591 = vmatprep.mubr.msk.f32.mxu0 %vm625_vm2, %v624_v2  ;;  %590 = vmatpush3.msk.msra.mxu0 %vm45_vm0, %v365_v16 }
 0x18b   :  { %v353_v17 = vpop.f32.mrf.mxu1 }
 0x18d   :  { %v278_v19 = vpop.f32.mrf.mxu0  ;;  %v588_v20 = vpop.f32.mrf.mxu1 }
 0x18e   :  { %v354_v21 = vadd.f32 %v353_v17, %v278_v19 }
 0x18f   :  { %v583_v22 = vpop.f32.mrf.mxu0 }
 0x190   :  { %v363_v23 = vadd.f32 %v551_v18, %v354_v21 }
 0x192   :  { %v368_v24 = vrot.slane %v363_v23, 2  ;;  %597 = vmatmul.mubr.msk.f32.vlgmr.msra.gmra.mxu1 %vm41_vm1, %v363_v23 }
 0x194   :  { %592 = vmatmul.mubr.msk.f32.vlgmr.msra.gmra.mxu0 %vm41_vm1, %v368_v24 }
 0x252   :  { %v515_v25 = vpop.f32.mrf.mxu1 }
 0x254   :  { %v440_v27 = vpop.f32.mrf.mxu0  ;;  %v598_v28 = vpop.f32.mrf.mxu1 }
 0x255   :  { %v516_v29 = vadd.f32 %v515_v25, %v440_v27 }
 0x256   :  { %v593_v30 = vpop.f32.mrf.mxu0 }
 0x257   :  { %v525_v31 = vadd.f32 %v556_v26, %v516_v29 }
 0x259   :  { %527 = vst.msk [vmem:[#allocation2] sm:$0x3] %vm526_vm3, %v525_v31 }
 0x25a   :  { %613 = shalt.err (!%p610_p4)
}
 0x25b   :  { %537 = dma.vmem_to_hbm [thread:$0]  %s535_s28, 32, %s746_s10, [#allocation3]  }
 0x25c   :  { %622 = dma.done.wait [#allocation3], 32  }
 0x25d   :  { %623 = vsyncadd [#allocation3], 4294967264 }
 0x25e   :  { %541 = vsyncpa [#allocation3], 1 }

</bundles_post_ra>
